<compile_context>
chip_gen: v5e
topology: v5e:2x2
jax: 0.10.0
libtpu: 0.0.40
codegen_flags: <defaults>
</compile_context>

<pallas_src>
import functools

import jax
import jax.numpy as jnp
from jax import lax
from jax.experimental import pallas as pl
from jax.experimental.pallas import tpu as pltpu


_NEG_INF = -1e30  # large negative (not -inf) for masking padded keys


def _round_up(x, m):
    return ((x + m - 1) // m) * m


def _default_tiles():
    """Pick MXU-friendly tile sizes per TPU generation (fallback: 256)."""
    try:
        kind = jax.devices()[0].device_kind.lower()
    except Exception:  # pragma: no cover - defensive
        kind = ""
    if "v5 lite" in kind or "v5e" in kind or "v5lite" in kind:
        return 128, 128  # v5e: 4x128x128 MXU, 16 MiB default scoped VMEM
    return 256, 256      # v6e / v7x: 2x256x256 MXU


def _flash_attn_kernel(q_ref, k_ref, v_ref, o_ref, m_ref, l_ref, acc_ref,
                       *, tk, lk_actual, mask_keys):
    """Online-softmax attention for one (batch, q-tile) over the k-tile axis.

    Refs (batch dim squeezed):
      q_ref: (tq, D)   k_ref: (tk, D)   v_ref: (tk, Dv)   o_ref: (tq, Dv)
    Scratch (persist across the k loop):
      m_ref, l_ref: (tq, 1) f32      acc_ref: (tq, Dv) f32
    """
    ki = pl.program_id(2)

    @pl.when(ki == 0)
    def _init():
        m_ref[...] = jnp.full(m_ref.shape, -jnp.inf, dtype=m_ref.dtype)
        l_ref[...] = jnp.zeros(l_ref.shape, dtype=l_ref.dtype)
        acc_ref[...] = jnp.zeros(acc_ref.shape, dtype=acc_ref.dtype)

    q = q_ref[...]
    k = k_ref[...]
    v = v_ref[...]

    # scores: (tq, tk) = q @ k^T, accumulated in f32 on the MXU.
    s = lax.dot_general(q, k, (((1,), (1,)), ((), ())),
                        preferred_element_type=jnp.float32)

    if mask_keys:
        key_pos = ki * tk + lax.broadcasted_iota(jnp.int32, s.shape, 1)
        s = jnp.where(key_pos < lk_actual, s, _NEG_INF)

    m_prev = m_ref[...]                                       # (tq, 1)
    m_new = jnp.maximum(m_prev, jnp.max(s, axis=-1, keepdims=True))
    alpha = jnp.exp(m_prev - m_new)                           # rescale old stats
    p = jnp.exp(s - m_new)                                    # (tq, tk)

    l_ref[...] = alpha * l_ref[...] + jnp.sum(p, axis=-1, keepdims=True)
    acc_ref[...] = alpha * acc_ref[...] + jnp.dot(
        p.astype(v.dtype), v, preferred_element_type=jnp.float32)
    m_ref[...] = m_new

    @pl.when(ki == pl.num_programs(2) - 1)
    def _finalize():
        inv_l = pl.reciprocal(l_ref[...], approx=True)        # EUP vrcp slot
        o_ref[...] = (acc_ref[...] * inv_l).astype(o_ref.dtype)


def attention(query, key, value, *, tq_max=None, tk_max=None):
    """softmax(Q @ K^T, dim=-1) @ V via a flash-style Pallas TPU kernel.

    query: [B, Lq, D], key: [B, Lk, D], value: [B, Lk, Dv] -> [B, Lq, Dv]
    (Callers chasing peak throughput should pass bf16 Q/K/V; accumulation is f32.)
    """
    B, Lq, D = query.shape
    Bk, Lk, Dk = key.shape
    Bv, Lkv, Dv = value.shape
    assert B == Bk == Bv and D == Dk and Lk == Lkv

    dflt_tq, dflt_tk = _default_tiles()
    tq_max = dflt_tq if tq_max is None else tq_max
    tk_max = dflt_tk if tk_max is None else tk_max

    # Lane-dense feature dims; sublane/MXU aligned sequence tiles.
    d_pad = _round_up(D, 128)
    dv_pad = _round_up(Dv, 128)
    tq = min(tq_max, _round_up(Lq, 8))
    tk = min(tk_max, _round_up(Lk, 128))
    lq_pad = _round_up(Lq, tq)
    lk_pad = _round_up(Lk, tk)

    q = jnp.pad(query, ((0, 0), (0, lq_pad - Lq), (0, d_pad - D)))
    k = jnp.pad(key, ((0, 0), (0, lk_pad - Lk), (0, d_pad - D)))
    v = jnp.pad(value, ((0, 0), (0, lk_pad - Lk), (0, dv_pad - Dv)))

    grid = (B, lq_pad // tq, lk_pad // tk)
    kernel = functools.partial(
        _flash_attn_kernel, tk=tk, lk_actual=Lk, mask_keys=(lk_pad != Lk))

    out_padded = pl.pallas_call(
        kernel,
        out_shape=jax.ShapeDtypeStruct((B, lq_pad, dv_pad), query.dtype),
        grid_spec=pltpu.PrefetchScalarGridSpec(
            num_scalar_prefetch=0,
            grid=grid,
            in_specs=[
                # Leading None squeezes the batch dim: kernel sees 2-D tiles.
                pl.BlockSpec((None, tq, d_pad), lambda b, qi, ki: (b, qi, 0)),
                pl.BlockSpec((None, tk, d_pad), lambda b, qi, ki: (b, ki, 0)),
                pl.BlockSpec((None, tk, dv_pad), lambda b, qi, ki: (b, ki, 0)),
            ],
            out_specs=pl.BlockSpec((None, tq, dv_pad), lambda b, qi, ki: (b, qi, 0)),
            scratch_shapes=[
                pltpu.VMEM((tq, 1), jnp.float32),       # running max m
                pltpu.VMEM((tq, 1), jnp.float32),       # running denom l
                pltpu.VMEM((tq, dv_pad), jnp.float32),  # running numerator acc
            ],
        ),
        compiler_params=pltpu.CompilerParams(
            dimension_semantics=("parallel", "parallel", "arbitrary"),
            vmem_limit_bytes=32 * 1024 * 1024,  # explicit, with headroom on v7x's 64 MiB
        ),
    )(q, k, v)

    return out_padded[:, :Lq, :Dv]


def _reference_attention(query, key, value):
    s = jnp.einsum("bqd,bkd->bqk", query, key)
    p = jax.nn.softmax(s, axis=-1)
    return jnp.einsum("bqk,bkd->bqd", p, value)


if __name__ == "__main__":
    root = jax.random.PRNGKey(0)
    kq, kk, kv = jax.random.split(root, 3)

    # Small shape consistent with the module's (batch, seq, hidden) usage.
    B, Lq, Lk, D = 2, 8, 8, 32
    q = jax.random.normal(kq, (B, Lq, D), dtype=jnp.float32)
    k = jax.random.normal(kk, (B, Lk, D), dtype=jnp.float32)
    v = jax.random.normal(kv, (B, Lk, D), dtype=jnp.float32)

    out = jax.block_until_ready(attention(q, k, v))
    ref = _reference_attention(q, k, v)
    assert out.shape == ref.shape
    assert jnp.allclose(out, ref, atol=3e-3, rtol=3e-3), (
        float(jnp.max(jnp.abs(out - ref))))

    # Non-aligned shapes: exercises multi-tile online-softmax accumulation,
    # key-padding masking, and the padded lane-dense output path.
    kq2, kk2, kv2 = jax.random.split(jax.random.PRNGKey(1), 3)
    B2, Lq2, Lk2, D2, Dv2 = 2, 300, 400, 64, 48
    q2 = jax.random.normal(kq2, (B2, Lq2, D2), dtype=jnp.float32)
    k2 = jax.random.normal(kk2, (B2, Lk2, D2), dtype=jnp.float32)
    v2 = jax.random.normal(kv2, (B2, Lk2, Dv2), dtype=jnp.float32)

    out2 = jax.block_until_ready(attention(q2, k2, v2))
    ref2 = _reference_attention(q2, k2, v2)
    assert out2.shape == ref2.shape
    assert jnp.allclose(out2, ref2, atol=3e-3, rtol=3e-3), (
        float(jnp.max(jnp.abs(out2 - ref2))))

    print("KERNEL_OK")
</pallas_src>

<mosaic_0001>
module attributes {stable_mosaic.version = 11 : i64} {
  func.func @_flash_attn_kernel(%arg0: i32, %arg1: i32, %arg2: i32, %arg3: memref<1x8x128xf32, #tpu.memory_space<vmem>>, %arg4: memref<1x128x128xf32, #tpu.memory_space<vmem>>, %arg5: memref<1x128x128xf32, #tpu.memory_space<vmem>>, %arg6: memref<1x8x128xf32, #tpu.memory_space<vmem>>, %arg7: memref<8x1xf32, #tpu.memory_space<vmem>>, %arg8: memref<8x1xf32, #tpu.memory_space<vmem>>, %arg9: memref<8x128xf32, #tpu.memory_space<vmem>>) attributes {dimension_semantics = [#tpu.dimension_semantics<parallel>, #tpu.dimension_semantics<parallel>, #tpu.dimension_semantics<arbitrary>], iteration_bounds = array<i64: 2, 1, 1>, scalar_prefetch = 0 : i64, scratch_operands = 3 : i64, tpu.core_type = #tpu.core_type<tc>, window_params = [{transform_indices = @transform_0, window_bounds = array<i64: 1, 8, 128>}, {transform_indices = @transform_1, window_bounds = array<i64: 1, 128, 128>}, {transform_indices = @transform_2, window_bounds = array<i64: 1, 128, 128>}, {transform_indices = @transform_3, window_bounds = array<i64: 1, 8, 128>}]} {
    %c0_i32 = arith.constant 0 : i32
    %0 = arith.cmpi eq, %arg2, %c0_i32 : i32
    %1 = arith.extui %0 : i1 to i32
    %c0_i32_0 = arith.constant 0 : i32
    %2 = arith.cmpi ne, %1, %c0_i32_0 : i32
    scf.if %2 {
      %cst_27 = arith.constant 0xFF800000 : f32
      %43 = vector.broadcast %cst_27 : f32 to vector<8x1xf32>
      %c0_28 = arith.constant 0 : index
      %c0_29 = arith.constant 0 : index
      %44 = vector.load %arg7[%c0_28, %c0_29] : memref<8x1xf32, #tpu.memory_space<vmem>>, vector<8x1xf32>
      tpu.vector_store %arg7[%c0_28, %c0_29], %43 {strides = array<i32>} : memref<8x1xf32, #tpu.memory_space<vmem>>, vector<8x1xf32>,
      %cst_30 = arith.constant 0.000000e+00 : f32
      %45 = vector.broadcast %cst_30 : f32 to vector<8x1xf32>
      %c0_31 = arith.constant 0 : index
      %c0_32 = arith.constant 0 : index
      %46 = vector.load %arg8[%c0_31, %c0_32] : memref<8x1xf32, #tpu.memory_space<vmem>>, vector<8x1xf32>
      tpu.vector_store %arg8[%c0_31, %c0_32], %45 {strides = array<i32>} : memref<8x1xf32, #tpu.memory_space<vmem>>, vector<8x1xf32>,
      %cst_33 = arith.constant 0.000000e+00 : f32
      %47 = vector.broadcast %cst_33 : f32 to vector<8x128xf32>
      %c0_34 = arith.constant 0 : index
      %c0_35 = arith.constant 0 : index
      %48 = vector.load %arg9[%c0_34, %c0_35] : memref<8x128xf32, #tpu.memory_space<vmem>>, vector<8x128xf32>
      tpu.vector_store %arg9[%c0_34, %c0_35], %47 {strides = array<i32>} : memref<8x128xf32, #tpu.memory_space<vmem>>, vector<8x128xf32>,
    } else {
    }
    %c0 = arith.constant 0 : index
    %c0_1 = arith.constant 0 : index
    %c0_2 = arith.constant 0 : index
    %3 = vector.load %arg3[%c0, %c0_1, %c0_2] : memref<1x8x128xf32, #tpu.memory_space<vmem>>, vector<1x8x128xf32>
    %4 = vector.shape_cast %3 : vector<1x8x128xf32> to vector<8x128xf32>
    %c0_3 = arith.constant 0 : index
    %c0_4 = arith.constant 0 : index
    %c0_5 = arith.constant 0 : index
    %5 = vector.load %arg4[%c0_3, %c0_4, %c0_5] : memref<1x128x128xf32, #tpu.memory_space<vmem>>, vector<1x128x128xf32>
    %6 = vector.shape_cast %5 : vector<1x128x128xf32> to vector<128x128xf32>
    %c0_6 = arith.constant 0 : index
    %c0_7 = arith.constant 0 : index
    %c0_8 = arith.constant 0 : index
    %7 = vector.load %arg5[%c0_6, %c0_7, %c0_8] : memref<1x128x128xf32, #tpu.memory_space<vmem>>, vector<1x128x128xf32>
    %8 = vector.shape_cast %7 : vector<1x128x128xf32> to vector<128x128xf32>
    %cst = arith.constant dense<0.000000e+00> : vector<8x128xf32>
    %9 = tpu.matmul %4, %6, %cst {dimension_numbers = #tpu.dot_dimension_numbers<[1], [1], [0], [0], [0, 0, 1, 0], [], []>} : vector<8x128xf32>, vector<128x128xf32>, vector<8x128xf32> -> vector<8x128xf32>
    %c128_i32 = arith.constant 128 : i32
    %10 = arith.muli %arg2, %c128_i32 : i32
    %11 = tpu.iota {dimensions = array<i32: 1>} : vector<8x128xi32>
    %12 = vector.broadcast %10 : i32 to vector<8x128xi32>
    %13 = arith.addi %12, %11 : vector<8x128xi32>
    %c8_i32 = arith.constant 8 : i32
    %14 = vector.broadcast %c8_i32 : i32 to vector<8x128xi32>
    %15 = arith.cmpi slt, %13, %14 : vector<8x128xi32>
    %cst_9 = arith.constant -1.000000e+30 : f32
    %16 = vector.broadcast %cst_9 : f32 to vector<8x128xf32>
    %17 = arith.select %15, %9, %16 : vector<8x128xi1>, vector<8x128xf32>
    %c0_10 = arith.constant 0 : index
    %c0_11 = arith.constant 0 : index
    %18 = vector.load %arg7[%c0_10, %c0_11] : memref<8x1xf32, #tpu.memory_space<vmem>>, vector<8x1xf32>
    %cst_12 = arith.constant dense<0xFF800000> : vector<8xf32>
    %19 = vector.multi_reduction <maximumf>, %17, %cst_12 [1] : vector<8x128xf32> to vector<8xf32>
    %20 = vector.shape_cast %19 : vector<8xf32> to vector<8x1xf32>
    %21 = arith.maximumf %18, %20 : vector<8x1xf32>
    %22 = arith.subf %18, %21 : vector<8x1xf32>
    %23 = math.exp %22 : vector<8x1xf32>
    %24 = vector.broadcast %21 : vector<8x1xf32> to vector<8x128xf32>
    %25 = arith.subf %17, %24 : vector<8x128xf32>
    %26 = math.exp %25 : vector<8x128xf32>
    %c0_13 = arith.constant 0 : index
    %c0_14 = arith.constant 0 : index
    %27 = vector.load %arg8[%c0_13, %c0_14] : memref<8x1xf32, #tpu.memory_space<vmem>>, vector<8x1xf32>
    %28 = arith.mulf %23, %27 : vector<8x1xf32>
    %cst_15 = arith.constant dense<0.000000e+00> : vector<8xf32>
    %29 = vector.multi_reduction <add>, %26, %cst_15 [1] : vector<8x128xf32> to vector<8xf32>
    %30 = vector.shape_cast %29 : vector<8xf32> to vector<8x1xf32>
    %31 = arith.addf %28, %30 : vector<8x1xf32>
    %c0_16 = arith.constant 0 : index
    %c0_17 = arith.constant 0 : index
    %32 = vector.load %arg8[%c0_16, %c0_17] : memref<8x1xf32, #tpu.memory_space<vmem>>, vector<8x1xf32>
    tpu.vector_store %arg8[%c0_16, %c0_17], %31 {strides = array<i32>} : memref<8x1xf32, #tpu.memory_space<vmem>>, vector<8x1xf32>,
    %c0_18 = arith.constant 0 : index
    %c0_19 = arith.constant 0 : index
    %33 = vector.load %arg9[%c0_18, %c0_19] : memref<8x128xf32, #tpu.memory_space<vmem>>, vector<8x128xf32>
    %34 = vector.broadcast %23 : vector<8x1xf32> to vector<8x128xf32>
    %35 = arith.mulf %34, %33 : vector<8x128xf32>
    %cst_20 = arith.constant dense<0.000000e+00> : vector<8x128xf32>
    %36 = tpu.matmul %26, %8, %cst_20 {dimension_numbers = #tpu.dot_dimension_numbers<[1], [0], [0], [1], [0, 0, 1, 1], [], []>} : vector<8x128xf32>, vector<128x128xf32>, vector<8x128xf32> -> vector<8x128xf32>
    %37 = arith.addf %35, %36 : vector<8x128xf32>
    %c0_21 = arith.constant 0 : index
    %c0_22 = arith.constant 0 : index
    %38 = vector.load %arg9[%c0_21, %c0_22] : memref<8x128xf32, #tpu.memory_space<vmem>>, vector<8x128xf32>
    tpu.vector_store %arg9[%c0_21, %c0_22], %37 {strides = array<i32>} : memref<8x128xf32, #tpu.memory_space<vmem>>, vector<8x128xf32>,
    %c0_23 = arith.constant 0 : index
    %c0_24 = arith.constant 0 : index
    %39 = vector.load %arg7[%c0_23, %c0_24] : memref<8x1xf32, #tpu.memory_space<vmem>>, vector<8x1xf32>
    tpu.vector_store %arg7[%c0_23, %c0_24], %21 {strides = array<i32>} : memref<8x1xf32, #tpu.memory_space<vmem>>, vector<8x1xf32>,
    %c0_i32_25 = arith.constant 0 : i32
    %40 = arith.cmpi eq, %arg2, %c0_i32_25 : i32
    %41 = arith.extui %40 : i1 to i32
    %c0_i32_26 = arith.constant 0 : i32
    %42 = arith.cmpi ne, %41, %c0_i32_26 : i32
    scf.if %42 {
      %c0_27 = arith.constant 0 : index
      %c0_28 = arith.constant 0 : index
      %43 = vector.load %arg8[%c0_27, %c0_28] : memref<8x1xf32, #tpu.memory_space<vmem>>, vector<8x1xf32>
      %44 = tpu.reciprocal %43 {approx = true} : vector<8x1xf32> -> vector<8x1xf32>
      %c0_29 = arith.constant 0 : index
      %c0_30 = arith.constant 0 : index
      %45 = vector.load %arg9[%c0_29, %c0_30] : memref<8x128xf32, #tpu.memory_space<vmem>>, vector<8x128xf32>
      %46 = vector.broadcast %44 : vector<8x1xf32> to vector<8x128xf32>
      %47 = arith.mulf %45, %46 : vector<8x128xf32>
      %c0_31 = arith.constant 0 : index
      %c0_32 = arith.constant 0 : index
      %c0_33 = arith.constant 0 : index
      %48 = vector.load %arg6[%c0_31, %c0_32, %c0_33] : memref<1x8x128xf32, #tpu.memory_space<vmem>>, vector<1x8x128xf32>
      %49 = vector.shape_cast %48 : vector<1x8x128xf32> to vector<8x128xf32>
      %50 = vector.shape_cast %47 : vector<8x128xf32> to vector<1x8x128xf32>
      tpu.vector_store %arg6[%c0_31, %c0_32, %c0_33], %50 {strides = array<i32>} : memref<1x8x128xf32, #tpu.memory_space<vmem>>, vector<1x8x128xf32>,
    } else {
    }
    return
  }
  func.func @transform_0(%arg0: i32, %arg1: i32, %arg2: i32) -> (i32, i32, i32) {
    %c0_i32 = arith.constant 0 : i32
    %c0_i32_0 = arith.constant 0 : i32
    return %arg0, %arg1, %c0_i32 : i32, i32, i32
  }
  func.func @transform_1(%arg0: i32, %arg1: i32, %arg2: i32) -> (i32, i32, i32) {
    %c0_i32 = arith.constant 0 : i32
    %c0_i32_0 = arith.constant 0 : i32
    return %arg0, %arg2, %c0_i32 : i32, i32, i32
  }
  func.func @transform_2(%arg0: i32, %arg1: i32, %arg2: i32) -> (i32, i32, i32) {
    %c0_i32 = arith.constant 0 : i32
    %c0_i32_0 = arith.constant 0 : i32
    return %arg0, %arg2, %c0_i32 : i32, i32, i32
  }
  func.func @transform_3(%arg0: i32, %arg1: i32, %arg2: i32) -> (i32, i32, i32) {
    %c0_i32 = arith.constant 0 : i32
    %c0_i32_0 = arith.constant 0 : i32
    return %arg0, %arg1, %c0_i32 : i32, i32, i32
  }
}

</mosaic_0001>

<bundles_post_ra>
// kernel: tpu_custom_call.1
= control target key start
LH: loop header
LB: loop body
LE: loop exit
PB: predicated region body
PF: predicated region fallthrough
CT: control target
= control target key end

     0   :  { %s1101_s0 = inlined_call_operand.hbm [shape: f32[2,8,128], index: 0, kind: input, shape index: {}]   ;;  %s1102_s1 = inlined_call_operand.hbm [shape: f32[2,128,128], index: 1, kind: input, shape index: {}]   ;;  %s1103_s2 = inlined_call_operand.hbm [shape: f32[2,128,128], index: 2, kind: input, shape index: {}]   ;;  %s1104_s3 = inlined_call_operand.hbm [shape: f32[2,8,128], index: 3, kind: output, shape index: {}]  }
   0x1   :  { %1107 = sst [smem:[#allocation18_spill]] %s1102_s1 }
   0x2   :  { %8 = vsyncpa [#allocation6], 0 }
   0x3   :  { %10 = vsyncpa [#allocation6 + $0x1], 0 }
   0x4   :  { %11 = vsyncpa [#allocation9], 0 }
   0x5   :  { %13 = vsyncpa [#allocation9 + $0x1], 0 }
   0x6   :  { %14 = vsyncpa [#allocation7], 0 }
   0x7   :  { %16 = vsyncpa [#allocation7 + $0x1], 0  ;;  %s897_s12 = smov 0   ;;  %s899_s13 = smov 0  }
   0x8   :  { %s901_s14 = smov 0   ;;  %s903_s15 = smov 0  }
   0x9   :  { %s905_s16 = smov 0   ;;  %s907_s17 = smov 0  }
   0xa LB: > { %1108 = sst [smem:[#allocation15_spill]] %s858_s14  ;;  %s928_s18 = sadd.s32 4294967295, %s870_s17   ;;  %s870_s17 = sphi %s907_s17, %s22_s17   ;;  %s866_s16 = sphi %s905_s16, %s1123_s16   ;;  %s862_s15 = sphi %s903_s15, %s1122_s15   ;;  %s858_s14 = sphi %s901_s14, %s1118_s14   ;;  %s854_s13 = sphi %s899_s13, %s1121_s13   ;;  %s850_s12 = sphi %s897_s12, %s1120_s12  }
   0xb   : > { %s586_s19 = sadd.s32 4294967294, %s870_s17   ;;  %s41_s20 = sadd.s32 1, %s866_s16 }
   0xc   : > { %s50_s21 = sadd.s32 1, %s858_s14  ;;  %p43_p0 = scmp.ge.s32.totalorder %s41_s20, 2 }
   0xd   : > { %p57_p1 = scmp.ne.s32.totalorder %s858_s14, %s854_s13  ;;  %p58_p2 = scmp.eq.s32.totalorder %s870_s17, 0 }
   0xe   : > { %p63_p3 = scmp.ne.s32.totalorder %s854_s13, %s850_s12  ;;  %s1125_s20 = smov (%p43_p0, %s41_s20), 0 }
   0xf   : > { %1109 = sst [smem:[#allocation16_spill]] %s1125_s20  ;;  %p940_p4 = por %p58_p2, %p57_p1 }
  0x10   : > { %p64_p5 = scmp.eq.s32.totalorder %s928_s18, 0  ;;  %s45_s23 = ssub.s32 %s866_s16, %s1125_s20 }
  0x11   : > { %p145_p6 = scmp.eq.s32.totalorder %s928_s18, 1  ;;  %p48_p7 = scmp.eq.s32.totalorder %s45_s23, 0 }
  0x12   : > { %p948_p8 = por %p64_p5, %p63_p3  ;;  %p151_p10 = scmp.eq.s32.totalorder %s586_s19, 1 }
  0x13   : > { %p952_p9 = por %p145_p6, %p57_p1  ;;  %p588_p12 = scmp.ge.s32.totalorder %s870_s17, 2 }
  0x14   : > { %s957_s26 = scalar_select %p48_p7, %s858_s14, %s50_s21  }
  0x15   : > { %p959_p11 = por %p151_p10, %p63_p3  ;;  %p630_p13 = scmp.lt.s32.totalorder %s870_s17, 2 }
  0x16   : > { %1113 = sst [smem:[#allocation17_spill]] %s957_s26  ;;  %s966_s28 = sand.u32 1, %s858_s14  }
  0x17   : > { %s191_s29 = sand.u32 1, %s870_s17   ;;  %s591_s30 = sshll.u32 %s966_s28, 7 }
  0x18   : > { %p972_p0 = pnand %p630_p13, %p940_p4  ;;  %s606_s5 = sshll.u32 %s866_s16, 7 }
  0x19   : > { %s1116_s1 = sld [smem:[#allocation18_spill]]  ;;  %s195_s10 = scalar_lea.vmem [#allocation8], %s591_s30 }
  0x1a   : > { %s205_s11 = sshll.u32 %s195_s10, 4  ;;  %s192_s19 = scalar_lea.sflag [#allocation9], %s191_s29  ;;  %s206_s11 = int_to_ptr.vmem [resolvable:$true] %s205_s11 }
  0x1b   : > { %s872_s21 = smov 128   ;;  %s873_s22 = smov 8  }
  0x1c   : > { %s226_s26 = scalar_lea.hbm %s1103_s2, %s606_s5  ;;  %s219_s7 = scalar_lea.vmem [#allocation10], %s591_s30 }
  0x1d   : > { %s227_s6 = sshll.u32 %s226_s26, 4  ;;  %p597_p1 = scmp.ge.s32.totalorder %s870_s17, 1  ;;  %s228_s6 = int_to_ptr.hbm [resolvable:$true] %s227_s6 }
  0x1e   : > { %p237_p2 = scmp.lt.s32.totalorder %s870_s17, 3  ;;  %s589_s29 = sshll.u32 %s966_s28, 3 }
  0x1f   : > { %s202_s8 = scalar_lea.hbm %s1116_s1, %s606_s5  ;;  %s590_s10 = sshll.u32 %s866_s16, 3 }
  0x20   : > { %s203_s9 = sshll.u32 %s202_s8, 4  ;;  %s229_s8 = sshll.u32 %s219_s7, 4  ;;  %s204_s9 = int_to_ptr.hbm [resolvable:$true] %s203_s9  ;;  %s230_s8 = int_to_ptr.vmem [resolvable:$true] %s229_s8 }
  0x21   : > { %622 = dma.hbm_to_vmem [thread:$0]  (!%p972_p0), %s204_s9, 2048, %s206_s11, %s192_s19, %s872_s21, %s872_s21, %s873_s22  }
  0x22   : > { %p238_p3 = pnand %p597_p1, %p237_p2  ;;  %s180_s9 = scalar_lea.hbm %s1101_s0, %s590_s10 }
  0x23   : > { %s182_s11 = sshll.u32 %s180_s9, 4  ;;  %s175_s20 = scalar_lea.vmem [#allocation5], %s589_s29  ;;  %s183_s11 = int_to_ptr.hbm [resolvable:$true] %s182_s11 }
  0x24   : > { %s184_s5 = sshll.u32 %s175_s20, 4  ;;  %s172_s26 = scalar_lea.sflag [#allocation6], %s966_s28  ;;  %s185_s5 = int_to_ptr.vmem [resolvable:$true] %s184_s5 }
  0x25   : > { %619 = dma.hbm_to_vmem [thread:$0]  (!%p972_p0), %s183_s11, 128, %s185_s5, %s172_s26  }
  0x26   : > { %625 = dma.hbm_to_vmem [thread:$0]  (!%p972_p0), %s228_s6, 2048, %s230_s8, %s192_s19, %s872_s21, %s872_s21, %s873_s22  }
  0x27   : > { %241 = sbr.rel (%p238_p3) target bundleno = 712 (0x2c8), region = 32  ;;  %s998_s30 = sand.u32 (!%p238_p3), 1, %s854_s13  }
  0x28   : > { %s598_s1 = sshll.u32 (!%p238_p3), %s998_s30, 3  ;;  %s244_s14 = scalar_lea.sflag (!%p238_p3), [#allocation6], %s998_s30 }
  0x29   : > { %s1004_s23 = scalar_lea.vmem (!%p238_p3), [#allocation5], %s598_s1 }
  0x2c   : > { %837 = dma.done.wait (%p948_p8), %s244_s14, 128  }
  0x2d   : > { %839 = vsyncadd (%p948_p8), %s244_s14, 4294967168  ;;  %s253_s28 = sand.u32 1, %s928_s18   ;;  %s599_s4 = sshll.u32 %s998_s30, 7 }
  0x2e   : > { %s254_s19 = scalar_lea.sflag [#allocation9], %s253_s28  ;;  %s1014_s21 = scalar_lea.vmem [#allocation8], %s599_s4 }
  0x2f   : > { %841 = dma.done.wait (%p948_p8), %s254_s19, 4096  }
  0x30   : > { %843 = vsyncadd (%p948_p8), %s254_s19, 4294963200  ;;  %v327_v0 = vld [vmem:[%s1014_s21 + $0x78] sm:$0xff]  ;;  %v326_v1 = vld [vmem:[%s1014_s21 + $0x70] sm:$0xff]  ;;  %vm307_vm0 = vcmask 7168   ;;  %v874_v17 = vmov -inf   ;;  %v365_v18 = vlaneseq  ;;  %v875_v22 = vmov 0  }
  0x31   : > { %344 = vmatpush.xpose.msra.mxu0 %v327_v0  ;;  %v325_v2 = vld [vmem:[%s1014_s21 + $0x68] sm:$0xff]  ;;  %v324_v3 = vld [vmem:[%s1014_s21 + $0x60] sm:$0xff]  ;;  %v323_v4 = vld [vmem:[%s1014_s21 + $0x58] sm:$0xff]  ;;  %308 = vst.msk [vmem:[#allocation2] sm:$0xff] %vm307_vm0, %v874_v17  ;;  %685 = vset.pattern.permute.xlu0 %v875_v22  ;;  %v876_v23 = vmov 0.0   ;;  %s1041_s18 = scalar_lea.vmem [#allocation10], %s599_s4 }
  0x32   : > { %v322_v5 = vld [vmem:[%s1014_s21 + $0x50] sm:$0xff]  ;;  %v321_v6 = vld [vmem:[%s1014_s21 + $0x48] sm:$0xff]  ;;  %v320_v7 = vld [vmem:[%s1014_s21 + $0x40] sm:$0xff]  ;;  %v366_v19 = vand.u32 127, %v365_v18  ;;  %686 = vset.pattern.permute.xlu1 %v875_v22  ;;  %687 = vset.pattern.permute.xlu2 %v875_v22  ;;  %309 = vst.msk [vmem:[#allocation3] sm:$0xff] %vm307_vm0, %v876_v23  ;;  %s603_s24 = sshll.u32 %s862_s15, 3 }
  0x33   : > { %v319_v8 = vld [vmem:[%s1014_s21 + $0x38] sm:$0xff]  ;;  %v318_v9 = vld [vmem:[%s1014_s21 + $0x30] sm:$0xff]  ;;  %v317_v10 = vld [vmem:[%s1014_s21 + $0x28] sm:$0xff]  ;;  %s448_s7 = scalar_lea.hbm %s1104_s3, %s603_s24  ;;  %s300_s8 = scalar_lea.vmem [#allocation11], %s598_s1 }
  0x34   : > { %v316_v11 = vld [vmem:[%s1014_s21 + $0x20] sm:$0xff]  ;;  %v315_v12 = vld [vmem:[%s1014_s21 + $0x18] sm:$0xff]  ;;  %v314_v13 = vld [vmem:[%s1014_s21 + $0x10] sm:$0xff]  ;;  %vm369_vm1 = vcmp.lt.s32.totalorder %v366_v19, 8  ;;  %s450_s29 = sshll.u32 %s300_s8, 4  ;;  %s452_s10 = sshll.u32 %s448_s7, 4  ;;  %s451_s29 = int_to_ptr.vmem [resolvable:$true] %s450_s29  ;;  %s453_s10 = int_to_ptr.hbm [resolvable:$true] %s452_s10 }
  0x35   : > { %345 = vmatpush.xpose.msra.mxu0 %v326_v1  ;;  %v313_v14 = vld [vmem:[%s1014_s21 + $0x8] sm:$0xff]  ;;  %v312_v15 = vld [vmem:[%s1014_s21] sm:$0xff]  ;;  %v311_v16 = vld [vmem:[%s1004_s23] sm:$0xff]  ;;  %s437_s9 = scalar_lea.sflag [#allocation7], %s998_s30  ;;  %s798_s11 = sshra.s32 %s453_s10, 4  ;;  %s799_s11 = int_to_ptr.hbm [resolvable:$true] %s798_s11 }
  0x36   : > { %v343_v24 = vld [vmem:[%s1041_s18 + $0x78] sm:$0xff]  ;;  %v342_v25 = vld [vmem:[%s1041_s18 + $0x70] sm:$0xff]  ;;  %v341_v26 = vld [vmem:[%s1041_s18 + $0x68] sm:$0xff]  ;;  %s800_s15 = scalar_lea.hbm %s799_s11, 8  ;;  %s804_s26 = scalar_lea.hbm %s1104_s3, 16 }
  0x37   : > { %400 = vmatpush.msra.mxu1 %v343_v24  ;;  %v340_v27 = vld [vmem:[%s1041_s18 + $0x60] sm:$0xff]  ;;  %v339_v28 = vld [vmem:[%s1041_s18 + $0x58] sm:$0xff]  ;;  %v338_v29 = vld [vmem:[%s1041_s18 + $0x50] sm:$0xff]  ;;  %p801_p4 = scmp.ne.s32.totalorder %s799_s11, %s800_s15  ;;  %p805_p7 = scmp.lt.s32.totalorder %s799_s11, %s1104_s3 }
  0x38   : > { %v337_v30 = vld [vmem:[%s1041_s18 + $0x48] sm:$0xff]  ;;  %v336_v31 = vld [vmem:[%s1041_s18 + $0x40] sm:$0xff]  ;;  %v335_v32 = vld [vmem:[%s1041_s18 + $0x38] sm:$0xff]  ;;  %p806_p8 = scmp.lt.s32.totalorder %s804_s26, %s800_s15 }
  0x39   : > { %346 = vmatpush.xpose.msra.mxu0 %v325_v2  ;;  %401 = vmatpush.msra.mxu1 %v342_v25  ;;  %v334_v33 = vld [vmem:[%s1041_s18 + $0x30] sm:$0xff]  ;;  %v371_v34 = vld [vmem:[#allocation2] sm:$0xff]  ;;  %v333_v38 = vld [vmem:[%s1041_s18 + $0x28] sm:$0xff]  ;;  %p802_p5 = pnand %p801_p4, %p952_p9 }
  0x3a   : > { %v332_v39 = vld [vmem:[%s1041_s18 + $0x20] sm:$0xff]  ;;  %v331_v40 = vld [vmem:[%s1041_s18 + $0x18] sm:$0xff]  ;;  %v330_v41 = vld [vmem:[%s1041_s18 + $0x10] sm:$0xff]  ;;  %p807_p10 = por %p806_p8, %p805_p7 }
  0x3b   : > { %402 = vmatpush.msra.mxu1 %v341_v26  ;;  %v329_v42 = vld [vmem:[%s1041_s18 + $0x8] sm:$0xff]  ;;  %v328_v43 = vld [vmem:[%s1041_s18] sm:$0xff]  ;;  %p803_p6 = pneg %p802_p5 }
  0x3c   : > { %v386_v50 = vld [vmem:[#allocation3] sm:$0xff] }
  0x3d   : > { %347 = vmatpush.xpose.msra.mxu0 %v324_v3  ;;  %403 = vmatpush.msra.mxu1 %v340_v27  ;;  %p808_p13 = pnand %p807_p10, %p803_p6 }
  0x3f   : > { %404 = vmatpush.msra.mxu1 %v339_v28 }
  0x41   : > { %348 = vmatpush.xpose.msra.mxu0 %v323_v4  ;;  %405 = vmatpush.msra.mxu1 %v338_v29 }
  0x43   : > { %406 = vmatpush.msra.mxu1 %v337_v30 }
  0x45   : > { %349 = vmatpush.xpose.msra.mxu0 %v322_v5  ;;  %407 = vmatpush.msra.mxu1 %v336_v31 }
  0x47   : > { %408 = vmatpush.msra.mxu1 %v335_v32 }
  0x49   : > { %350 = vmatpush.xpose.msra.mxu0 %v321_v6  ;;  %409 = vmatpush.msra.mxu1 %v334_v33 }
  0x4b   : > { %410 = vmatpush.msra.mxu1 %v333_v38 }
  0x4d   : > { %351 = vmatpush.xpose.msra.mxu0 %v320_v7  ;;  %411 = vmatpush.msra.mxu1 %v332_v39 }
  0x4f   : > { %412 = vmatpush.msra.mxu1 %v331_v40 }
  0x51   : > { %352 = vmatpush.xpose.msra.mxu0 %v319_v8  ;;  %413 = vmatpush.msra.mxu1 %v330_v41 }
  0x53   : > { %414 = vmatpush.msra.mxu1 %v329_v42 }
  0x55   : > { %353 = vmatpush.xpose.msra.mxu0 %v318_v9  ;;  %415 = vmatpush.msra.mxu1 %v328_v43 }
  0x59   : > { %354 = vmatpush.xpose.msra.mxu0 %v317_v10 }
  0x5d   : > { %355 = vmatpush.xpose.msra.mxu0 %v316_v11 }
  0x61   : > { %356 = vmatpush.xpose.msra.mxu0 %v315_v12 }
  0x65   : > { %357 = vmatpush.xpose.msra.mxu0 %v314_v13 }
  0x69   : > { %358 = vmatpush.xpose.msra.mxu0 %v313_v14 }
  0x6d   : > { %359 = vmatpush.xpose.msra.mxu0 %v312_v15 }
  0x70   : > { %360 = vmatmul.f32.vlgmr.msra.gmra.mxu0 %v311_v16 }
  0xed   : > { %v361_v20 = vpop.f32.mrf.mxu0 }
  0xee   : > { %v370_v21 = vsel %vm369_vm1, %v361_v20, -1e+30 }
  0xef   : > { %372 = vmax.xlane.f32.xlu0 %v370_v21 }
 0x162   : > { %v373_v35 = vpop.xlane.xlu0 %372 }
 0x163   : > { %v374_v36 = vmax.f32 %v371_v34, %v373_v35 }
 0x165   : > { %v375_v37 = vsub.f32 %v371_v34, %v374_v36  ;;  %422 = vst.msk [vmem:[#allocation2] sm:$0xff] %vm307_vm0, %v374_v36  ;;  %380 = vperm.xlu0 %685, %v374_v36  }
 0x167   : > { %v376_v48 = vmul.f32 1.442695, %v375_v37 }
 0x1d7   : > { %v381_v44 = vpop.permute.xlu0 %380 }
 0x1d8   : > { %v383_v45 = vsub.f32 %v370_v21, %v381_v44 }
 0x1da   : > { %v384_v46 = vmul.f32 1.442695, %v383_v45 }
 0x1dc   : > { %688 = vpow2.f32 %v384_v46 }
 0x1dd   : > { %690 = vpow2.f32 %v376_v48 }
 0x1e2   : > { %v689_v47 = vpop.eup %688 }
 0x1e3   : > { %388 = vadd.xlane.f32.xlu1 %v689_v47  ;;  %416 = vmatmul.f32.vlgmr.msra.gmra.mxu1 %v689_v47  ;;  %v691_v49 = vpop.eup %690 }
 0x1e4   : > { %v387_v51 = vmul.f32 %v691_v49, %v386_v50 }
 0x1fc   : > { %396 = vperm.xlu1 %686, %v691_v49  }
 0x256   : > { %v389_v52 = vpop.xlane.xlu1 %388 }
 0x257   : > { %v390_v53 = vadd.f32 %v389_v52, %v387_v51 }
 0x259   : > { %392 = vst.msk [vmem:[#allocation3] sm:$0xff] %vm307_vm0, %v390_v53 }
 0x260   : > { %v426_v54 = vld [vmem:[#allocation3] sm:$0xff]  ;;  %v417_v58 = vpop.f32.mrf.mxu1 }
 0x261   : > { %692 = vrcp.f32 %v426_v54 }
 0x267   : > { %v693_v55 = vpop.eup %692 }
 0x268   : > { %431 = vperm.xlu2 %687, %v693_v55  }
 0x26e   : > { %v397_v56 = vpop.permute.xlu1 %396 }
 0x26f   : > { %v399_v57 = vmul.f32 0.0, %v397_v56 }
 0x271   : > { %v420_v59 = vadd.f32 %v417_v58, %v399_v57 }
 0x2c2   : > { %v432_v60 = vpop.permute.xlu2 %431 }
 0x2c3   : > { %v434_v61 = vmul.f32 %v432_v60, %v420_v59 }
 0x2c5   : > { %435 = vst [vmem:[%s300_s8] sm:$0xff] %v434_v61 }
 0x2c6   : > { %811 = shalt.err (!%p808_p13)
}
 0x2c7   : > { %614 = dma.vmem_to_hbm [thread:$0]  (%p952_p9), %s451_s29, 128, %s453_s10, %s437_s9  }
 0x2c8 PF: > { %s464_s30 = sand.u32 1, %s850_s12   ;;  %p627_p0 = pnand %p588_p12, %p959_p11 }
 0x2c9   : > { %s465_s23 = scalar_lea.sflag [#allocation7], %s464_s30 }
 0x2ca   : > { %p628_p1 = pneg %p627_p0 }
 0x2cc   : > { %845 = dma.done.wait (%p628_p1), %s465_s23, 128  }
 0x2cd   : > { %847 = vsyncadd (%p628_p1), %s465_s23, 4294967168  ;;  %s22_s17 = sadd.s32 1, %s870_s17   ;;  %s1117_s28 = sld [smem:[#allocation15_spill]] }
 0x2ce   : > { %p19_p2 = scmp.ge.s32.totalorder %s22_s17, 4   ;;  %s1118_s14 = sld [smem:[#allocation17_spill]] }
 0x2cf   : > { %s1119_s25 = sld [smem:[#allocation16_spill]]  ;;  %s1120_s12 = smov %s854_s13 }
 0x2d0   : > { %s1122_s15 = smov %s866_s16 }
 0x2d1   :  { %21 = sbr.rel (!%p19_p2) target bundleno = 10 (0xa), region = 109 }
 0x2d3   : > { %s1121_s13 = smov %s1117_s28 }
 0x2d5   : > { %s1123_s16 = smov %s1119_s25 }
 0x2d6   :  { %471 = vsyncpa [#allocation6], 1 }
 0x2d7   :  { %473 = vsyncpa [#allocation6 + $0x1], 1 }
 0x2d8   :  { %474 = vsyncpa [#allocation9], 1 }
 0x2d9   :  { %476 = vsyncpa [#allocation9 + $0x1], 1 }
 0x2da   :  { %477 = vsyncpa [#allocation7], 1 }
 0x2db   :  { %479 = vsyncpa [#allocation7 + $0x1], 1 }

</bundles_post_ra>
